<compile_context>
chip_gen: v6e
topology: v6e:2x2x1
jax: 0.10.0
libtpu: 0.0.40
codegen_flags: <defaults>
</compile_context>

<pallas_src>
import functools

import jax
import jax.numpy as jnp
from jax import lax
from jax.experimental import pallas as pl
from jax.experimental.pallas import tpu as pltpu


def _round_up(a: int, b: int) -> int:
    return ((a + b - 1) // b) * b


def _round_down(a: int, b: int) -> int:
    return (a // b) * b


def _cdiv(a: int, b: int) -> int:
    return (a + b - 1) // b


def _gap_kernel(x_ref, o_ref, acc_ref, *, inv_hw, tr, full_slices,
                last_full, last_tail, num_hw_chunks):
    # x_ref:   (tr, chunk)            input block in VMEM
    # o_ref:   (1, tr//128, 128)      lane-dense output block
    # acc_ref: (tr, 128)              f32 partial-sum scratch (persists across k)
    k = pl.program_id(1)  # hw-chunk (reduction) axis — last grid dim

    @pl.when(k == 0)
    def _init():
        acc_ref[...] = jnp.zeros_like(acc_ref)

    def accumulate(n_full, tail):
        # Lane-aligned partial sums on the VPU; widen each 128-lane slice to f32
        # as it is added (no whole-block f32 temp).  Cross-lane reduce is deferred
        # to finalize so the per-step work stays pure VPU / HBM-bound.
        for c in range(n_full):
            acc_ref[...] += x_ref[:, pl.ds(c * 128, 128)].astype(jnp.float32)
        if tail:
            sl = x_ref[:, pl.ds(n_full * 128, 128)].astype(jnp.float32)
            lane = lax.broadcasted_iota(jnp.int32, (tr, 128), 1)
            acc_ref[...] += jnp.where(lane < tail, sl, 0.0)

    last_is_full = (last_full == full_slices) and (last_tail == 0)
    if num_hw_chunks == 1:
        accumulate(last_full, last_tail)
    elif last_is_full:
        accumulate(full_slices, 0)
    else:
        @pl.when(k < num_hw_chunks - 1)
        def _full_chunk():
            accumulate(full_slices, 0)

        @pl.when(k == num_hw_chunks - 1)
        def _edge_chunk():
            accumulate(last_full, last_tail)

    @pl.when(k == num_hw_chunks - 1)
    def _finalize():
        # One 128->1 cross-lane reduce per row tile; repack per-row sums
        # lane-dense as (tr//128, 128).
        sums = jnp.sum(acc_ref[...].reshape(tr // 128, 128, 128), axis=-1)
        o_ref[...] = (sums * inv_hw).astype(o_ref.dtype).reshape(1, tr // 128, 128)


def global_avg_pool2d(x, *, target_block_bytes: int = 8 * 1024 * 1024):
    """Pallas equivalent of F.avg_pool2d(x, (H, W)).view(N, C) for NCHW input."""
    N, C, H, W = x.shape
    rows, hw = N * C, H * W
    dtype = x.dtype
    itemsize = jnp.dtype(dtype).itemsize

    xf = x.reshape(rows, hw)  # free view of contiguous NCHW; no padding copies

    # --- Byte-targeted tile selection -------------------------------------------
    budget_elems = max(target_block_bytes // itemsize, 128 * 128)

    # hw axis: lane-aligned chunk, capped so a 128-row tile still fits the budget.
    hw_aligned = _round_up(hw, 128)
    chunk_cap = max(128, _round_down(budget_elems // 128, 128))
    chunk = min(hw_aligned, chunk_cap)
    num_hw_chunks = _cdiv(hw, chunk)

    # rows axis: fill the byte budget, but when everything would fit in one tile,
    # split into two tiles so both v7x TensorCores get work on the parallel axis.
    tr_cap = max(128, _round_down(budget_elems // chunk, 128))
    rows_aligned = _round_up(rows, 128)
    if rows_aligned <= tr_cap:
        tr = min(rows_aligned, max(128, _round_up(_cdiv(rows, 2), 128)))
    else:
        tr = tr_cap
    num_row_tiles = _cdiv(rows, tr)
    # TODO(synk): for rows < 128 with very large H*W, shard the hw axis across
    # cores with a two-stage reduce instead of leaving one TensorCore idle.

    # Static geometry of the final (possibly partial) hw chunk.
    full_slices = chunk // 128
    last_rem = hw - (num_hw_chunks - 1) * chunk  # in (0, chunk]
    last_full = last_rem // 128
    last_tail = last_rem % 128

    block_bytes = tr * chunk * itemsize
    acc_bytes = tr * 128 * 4
    vmem_limit = max(32 * 1024 * 1024, 2 * block_bytes + acc_bytes + 4 * 1024 * 1024)

    cost = pl.CostEstimate(
        flops=rows * hw,
        transcendentals=0,
        bytes_accessed=rows * hw * itemsize + rows * itemsize,
    )

    kernel = functools.partial(
        _gap_kernel,
        inv_hw=1.0 / float(hw),   # true divisor; padding/garbage never enters sums
        tr=tr,
        full_slices=full_slices,
        last_full=last_full,
        last_tail=last_tail,
        num_hw_chunks=num_hw_chunks,
    )

    out = pl.pallas_call(
        kernel,
        out_shape=jax.ShapeDtypeStruct((num_row_tiles, tr // 128, 128), dtype),
        grid_spec=pltpu.PrefetchScalarGridSpec(
            num_scalar_prefetch=0,
            grid=(num_row_tiles, num_hw_chunks),
            in_specs=[pl.BlockSpec((tr, chunk), lambda i, k: (i, k))],
            out_specs=pl.BlockSpec((1, tr // 128, 128), lambda i, k: (i, 0, 0)),
            scratch_shapes=[pltpu.VMEM((tr, 128), jnp.float32)],
        ),
        compiler_params=pltpu.CompilerParams(
            dimension_semantics=("parallel", "arbitrary"),
            vmem_limit_bytes=vmem_limit,
        ),
        cost_estimate=cost,
    )(xf)

    # (row_tiles, tr//128, 128) lane-dense slab -> flat rows -> (N, C)
    return out.reshape(num_row_tiles * tr)[:rows].reshape(N, C)


if __name__ == "__main__":
    def _check(x, **kw):
        y = jax.block_until_ready(global_avg_pool2d(x, **kw))
        y_ref = jnp.mean(x.astype(jnp.float32), axis=(2, 3)).astype(x.dtype)
        assert y.shape == x.shape[:2]
        tol = 2e-2 if x.dtype == jnp.bfloat16 else 1e-5
        assert jnp.allclose(y.astype(jnp.float32), y_ref.astype(jnp.float32),
                            atol=tol, rtol=tol)

    key = jax.random.PRNGKey(0)
    k1, k2, k3, k4 = jax.random.split(key, 4)

    # Spec-consistent small shape: N=2, C=4, H=W=16 (NCHW).
    _check(jax.random.normal(k1, (2, 4, 16, 16), dtype=jnp.float32))
    # Non-128-aligned spatial (14x14) + two row tiles (rows=512): masked lane tail.
    _check(jax.random.normal(k2, (2, 256, 14, 14), dtype=jnp.float32))
    # Multi-chunk reduction axis with a masked final chunk (tiny byte budget).
    _check(jax.random.normal(k3, (2, 64, 37, 40), dtype=jnp.float32),
           target_block_bytes=64 * 1024)
    # bf16 input: per-slice f32 widening path.
    _check(jax.random.normal(k4, (2, 4, 16, 16), dtype=jnp.bfloat16))

    print("KERNEL_OK")
</pallas_src>

<mosaic_0001>
module attributes {stable_mosaic.version = 11 : i64} {
  func.func @_gap_kernel(%arg0: i32, %arg1: i32, %arg2: memref<128x256xf32, #tpu.memory_space<vmem>>, %arg3: memref<1x1x128xf32, #tpu.memory_space<vmem>>, %arg4: memref<128x128xf32, #tpu.memory_space<vmem>>) attributes {dimension_semantics = [#tpu.dimension_semantics<parallel>, #tpu.dimension_semantics<arbitrary>], iteration_bounds = array<i64: 1, 1>, scalar_prefetch = 0 : i64, scratch_operands = 1 : i64, tpu.core_type = #tpu.core_type<tc>, window_params = [{transform_indices = @transform_0, window_bounds = array<i64: 128, 256>}, {transform_indices = @transform_1, window_bounds = array<i64: 1, 1, 128>}]} {
    %c0_i32 = arith.constant 0 : i32
    %0 = arith.cmpi eq, %arg1, %c0_i32 : i32
    %1 = arith.extui %0 : i1 to i32
    %c0_i32_0 = arith.constant 0 : i32
    %2 = arith.cmpi ne, %1, %c0_i32_0 : i32
    scf.if %2 {
      %cst = arith.constant 0.000000e+00 : f32
      %14 = vector.broadcast %cst : f32 to vector<128x128xf32>
      %c0_13 = arith.constant 0 : index
      %c0_14 = arith.constant 0 : index
      %15 = vector.load %arg4[%c0_13, %c0_14] : memref<128x128xf32, #tpu.memory_space<vmem>>, vector<128x128xf32>
      tpu.vector_store %arg4[%c0_13, %c0_14], %14 {strides = array<i32>} : memref<128x128xf32, #tpu.memory_space<vmem>>, vector<128x128xf32>,
    } else {
    }
    %c0 = arith.constant 0 : index
    %c0_1 = arith.constant 0 : index
    %3 = vector.load %arg4[%c0, %c0_1] : memref<128x128xf32, #tpu.memory_space<vmem>>, vector<128x128xf32>
    %c0_2 = arith.constant 0 : index
    %c0_3 = arith.constant 0 : index
    %4 = vector.load %arg2[%c0_2, %c0_3] : memref<128x256xf32, #tpu.memory_space<vmem>>, vector<128x128xf32>
    %5 = arith.addf %3, %4 : vector<128x128xf32>
    %c0_4 = arith.constant 0 : index
    %c0_5 = arith.constant 0 : index
    %6 = vector.load %arg4[%c0_4, %c0_5] : memref<128x128xf32, #tpu.memory_space<vmem>>, vector<128x128xf32>
    tpu.vector_store %arg4[%c0_4, %c0_5], %5 {strides = array<i32>} : memref<128x128xf32, #tpu.memory_space<vmem>>, vector<128x128xf32>,
    %c0_6 = arith.constant 0 : index
    %c0_7 = arith.constant 0 : index
    %7 = vector.load %arg4[%c0_6, %c0_7] : memref<128x128xf32, #tpu.memory_space<vmem>>, vector<128x128xf32>
    %c0_8 = arith.constant 0 : index
    %c128 = arith.constant 128 : index
    %8 = vector.load %arg2[%c0_8, %c128] : memref<128x256xf32, #tpu.memory_space<vmem>>, vector<128x128xf32>
    %9 = arith.addf %7, %8 : vector<128x128xf32>
    %c0_9 = arith.constant 0 : index
    %c0_10 = arith.constant 0 : index
    %10 = vector.load %arg4[%c0_9, %c0_10] : memref<128x128xf32, #tpu.memory_space<vmem>>, vector<128x128xf32>
    tpu.vector_store %arg4[%c0_9, %c0_10], %9 {strides = array<i32>} : memref<128x128xf32, #tpu.memory_space<vmem>>, vector<128x128xf32>,
    %c0_i32_11 = arith.constant 0 : i32
    %11 = arith.cmpi eq, %arg1, %c0_i32_11 : i32
    %12 = arith.extui %11 : i1 to i32
    %c0_i32_12 = arith.constant 0 : i32
    %13 = arith.cmpi ne, %12, %c0_i32_12 : i32
    scf.if %13 {
      %c0_13 = arith.constant 0 : index
      %c0_14 = arith.constant 0 : index
      %14 = vector.load %arg4[%c0_13, %c0_14] : memref<128x128xf32, #tpu.memory_space<vmem>>, vector<128x128xf32>
      %15 = vector.shape_cast %14 : vector<128x128xf32> to vector<1x128x128xf32>
      %cst = arith.constant dense<0.000000e+00> : vector<1x128xf32>
      %16 = vector.multi_reduction <add>, %15, %cst [2] : vector<1x128x128xf32> to vector<1x128xf32>
      %cst_15 = arith.constant 3.906250e-03 : f32
      %17 = vector.broadcast %cst_15 : f32 to vector<1x128xf32>
      %18 = arith.mulf %16, %17 : vector<1x128xf32>
      %19 = vector.shape_cast %18 : vector<1x128xf32> to vector<1x1x128xf32>
      %c0_16 = arith.constant 0 : index
      %c0_17 = arith.constant 0 : index
      %c0_18 = arith.constant 0 : index
      %20 = vector.load %arg3[%c0_16, %c0_17, %c0_18] : memref<1x1x128xf32, #tpu.memory_space<vmem>>, vector<1x1x128xf32>
      tpu.vector_store %arg3[%c0_16, %c0_17, %c0_18], %19 {strides = array<i32>} : memref<1x1x128xf32, #tpu.memory_space<vmem>>, vector<1x1x128xf32>,
    } else {
    }
    return
  }
  func.func @transform_0(%arg0: i32, %arg1: i32) -> (i32, i32) {
    %c0_i32 = arith.constant 0 : i32
    return %arg0, %arg1 : i32, i32
  }
  func.func @transform_1(%arg0: i32, %arg1: i32) -> (i32, i32, i32) {
    %c0_i32 = arith.constant 0 : i32
    %c0_i32_0 = arith.constant 0 : i32
    %c0_i32_1 = arith.constant 0 : i32
    return %arg0, %c0_i32, %c0_i32_0 : i32, i32, i32
  }
}

</mosaic_0001>

<bundles_post_ra>
// kernel: tpu_custom_call.1
= control target key start
LH: loop header
LB: loop body
LE: loop exit
PB: predicated region body
PF: predicated region fallthrough
CT: control target
= control target key end

     0   :  { %6 = vsyncpa [#allocation4], 0  ;;  %s487_s0 = inlined_call_operand.hbm [shape: f32[8,256], index: 0, kind: input, shape index: {}]   ;;  %s488_s1 = inlined_call_operand.hbm [shape: f32[1,1,128], index: 1, kind: output, shape index: {}]  }
   0x1   :  { %7 = vsyncpa [#allocation5], 0 }
   0x2   :  { %12 = vsyncadd [#allocation4], 3840  ;;  %s430_s6 = smov [#allocation3]  }
   0x3   :  { %s13_s7 = sshll.u32 %s430_s6, 4  ;;  %s14_s7 = int_to_ptr.vmem [resolvable:$true] %s13_s7 }
   0x4   :  { %s394_s8 = scalar_lea.vmem %s14_s7, 256  ;;  %s398_s9 = scalar_lea.vmem %s14_s7, 4096 }
   0x5   :  { %p395_p0 = scmp.ne.s32.totalorder %s14_s7, %s394_s8  ;;  %p399_p1 = scmp.lt.s32.totalorder %s14_s7, %s14_s7 }
   0x6   :  { %p400_p2 = scmp.lt.s32.totalorder %s398_s9, %s394_s8 }
   0x8   :  { %p401_p3 = por %p400_p2, %p399_p1 }
   0xa   :  { %p402_p4 = pnand %p401_p3, %p395_p0 }
   0xc   :  { %405 = shalt.err (!%p402_p4)
}
   0xd   :  { %s431_s10 = smov 256   ;;  %s432_s11 = smov 16  }
   0xe   :  { %19 = dma.hbm_to_vmem [thread:$0]  %s487_s0, 256, %s14_s7, [#allocation4], %s431_s10, %s431_s10, %s432_s11  }
   0xf   :  { %426 = dma.done.wait [#allocation4], 4096  }
  0x10   :  { %427 = vsyncadd [#allocation4], 4294963200  ;;  %v59_v0 = vld [vmem:[#allocation3] sm:$0xff]  ;;  %v123_v1 = vld [vmem:[#allocation3 + $0x8] sm:$0xff]  ;;  %v254_v48 = vlaneseq  ;;  %vm265_vm0 = vcmask 130112   ;;  %vm272_vm1 = vcmask 195712  }
  0x11   :  { %v61_v2 = vld [vmem:[#allocation3 + $0x20] sm:$0xff]  ;;  %v139_v3 = vadd.f32 %v123_v1, %v59_v0  ;;  %v125_v4 = vld [vmem:[#allocation3 + $0x28] sm:$0xff]  ;;  %v60_v5 = vld [vmem:[#allocation3 + $0x10] sm:$0xff]  ;;  %vm279_vm2 = vcmask 261312   ;;  %vm286_vm3 = vcmask 326912   ;;  %vm293_vm4 = vcmask 392512  }
  0x12   :  { %v124_v6 = vld [vmem:[#allocation3 + $0x18] sm:$0xff]  ;;  %v141_v7 = vadd.f32 %v125_v4, %v61_v2  ;;  %v62_v8 = vld [vmem:[#allocation3 + $0x30] sm:$0xff]  ;;  %v63_v12 = vld [vmem:[#allocation3 + $0x40] sm:$0xff]  ;;  %v447_v49 = vand.u32 127, %v254_v48  ;;  %v449_v50 = vshrl.u32 %v254_v48, 7  ;;  %vm300_vm5 = vcmask 458112  }
  0x13   :  { %v126_v9 = vld [vmem:[#allocation3 + $0x38] sm:$0xff]  ;;  %190 = vadd.xlane.f32.xlu0 %v139_v3  ;;  %v140_v10 = vadd.f32 %v124_v6, %v60_v5  ;;  %v127_v13 = vld [vmem:[#allocation3 + $0x48] sm:$0xff]  ;;  %v64_v14 = vld [vmem:[#allocation3 + $0x50] sm:$0xff]  ;;  %vm307_vm6 = vcmask 523712   ;;  %vm314_vm7 = vcmask 589312   ;;  %vm321_vm8 = vcmask 654912  }
  0x14   :  { %194 = vadd.xlane.f32.xlu1 %v141_v7  ;;  %v142_v11 = vadd.f32 %v126_v9, %v62_v8  ;;  %v128_v15 = vld [vmem:[#allocation3 + $0x58] sm:$0xff]  ;;  %v143_v16 = vadd.f32 %v127_v13, %v63_v12  ;;  %v65_v18 = vld [vmem:[#allocation3 + $0x60] sm:$0xff]  ;;  %v129_v19 = vld [vmem:[#allocation3 + $0x68] sm:$0xff]  ;;  %v260_v51 = vadd.s32 4294967288, %v447_v49  ;;  %v267_v53 = vadd.s32 4294967280, %v447_v49  ;;  %s433_s0 = smov [#allocation6]  }
  0x15   :  { %v144_v17 = vadd.f32 %v128_v15, %v64_v14  ;;  %v66_v20 = vld [vmem:[#allocation3 + $0x70] sm:$0xff]  ;;  %v130_v21 = vld [vmem:[#allocation3 + $0x78] sm:$0xff]  ;;  %v145_v22 = vadd.f32 %v129_v19, %v65_v18  ;;  %v67_v24 = vld [vmem:[#allocation3 + $0x80] sm:$0xff]  ;;  %v274_v54 = vadd.s32 4294967272, %v447_v49  ;;  %v258_v56 = vsub.s32 %v447_v49, %v449_v50  ;;  %s373_s14 = sshll.u32 %s433_s0, 4  ;;  %s374_s14 = int_to_ptr.vmem [resolvable:$true] %s373_s14 }
  0x16   :  { %v146_v23 = vadd.f32 %v130_v21, %v66_v20  ;;  %v131_v25 = vld [vmem:[#allocation3 + $0x88] sm:$0xff]  ;;  %v68_v26 = vld [vmem:[#allocation3 + $0x90] sm:$0xff]  ;;  %v132_v27 = vld [vmem:[#allocation3 + $0x98] sm:$0xff]  ;;  %v263_v58 = vsub.s32 %v260_v51, %v449_v50  ;;  %v281_v59 = vadd.s32 4294967264, %v447_v49  ;;  %v270_v60 = vsub.s32 %v267_v53, %v449_v50  ;;  %s406_s15 = scalar_lea.vmem %s374_s14, 16  ;;  %s410_s16 = scalar_lea.vmem %s374_s14, 32 }
  0x17   :  { %192 = vadd.xlane.f32.xlu0 %v140_v10  ;;  %v147_v28 = vadd.f32 %v131_v25, %v67_v24  ;;  %v148_v29 = vadd.f32 %v132_v27, %v68_v26  ;;  %v69_v30 = vld [vmem:[#allocation3 + $0xa0] sm:$0xff]  ;;  %v133_v31 = vld [vmem:[#allocation3 + $0xa8] sm:$0xff]  ;;  %v70_v32 = vld [vmem:[#allocation3 + $0xb0] sm:$0xff]  ;;  %v277_v63 = vsub.s32 %v274_v54, %v449_v50  ;;  %v288_v0 = vadd.s32 4294967256, %v447_v49  ;;  %p407_p5 = scmp.ne.s32.totalorder %s374_s14, %s406_s15  ;;  %p411_p6 = scmp.lt.s32.totalorder %s374_s14, %s374_s14 }
  0x18   :  { %196 = vadd.xlane.f32.xlu1 %v142_v11  ;;  %v134_v33 = vld [vmem:[#allocation3 + $0xb8] sm:$0xff]  ;;  %v149_v34 = vadd.f32 %v133_v31, %v69_v30  ;;  %v71_v36 = vld [vmem:[#allocation3 + $0xc0] sm:$0xff]  ;;  %v135_v37 = vld [vmem:[#allocation3 + $0xc8] sm:$0xff]  ;;  %v284_v6 = vsub.s32 %v281_v59, %v449_v50  ;;  %v295_v7 = vadd.s32 4294967248, %v447_v49  ;;  %v302_v12 = vadd.s32 4294967240, %v447_v49  ;;  %p412_p7 = scmp.lt.s32.totalorder %s410_s16, %s406_s15 }
  0x19   :  { %v150_v35 = vadd.f32 %v134_v33, %v70_v32  ;;  %v72_v38 = vld [vmem:[#allocation3 + $0xd0] sm:$0xff]  ;;  %v136_v39 = vld [vmem:[#allocation3 + $0xd8] sm:$0xff]  ;;  %v151_v40 = vadd.f32 %v135_v37, %v71_v36  ;;  %v73_v42 = vld [vmem:[#allocation3 + $0xe0] sm:$0xff]  ;;  %v291_v11 = vsub.s32 %v288_v0, %v449_v50  ;;  %v309_v21 = vadd.s32 4294967232, %v447_v49 }
  0x1a   :  { %v152_v41 = vadd.f32 %v136_v39, %v72_v38  ;;  %v137_v43 = vld [vmem:[#allocation3 + $0xe8] sm:$0xff]  ;;  %v74_v44 = vld [vmem:[#allocation3 + $0xf0] sm:$0xff]  ;;  %v138_v45 = vld [vmem:[#allocation3 + $0xf8] sm:$0xff]  ;;  %v298_v20 = vsub.s32 %v295_v7, %v449_v50  ;;  %v305_v24 = vsub.s32 %v302_v12, %v449_v50  ;;  %v316_v25 = vadd.s32 4294967224, %v447_v49  ;;  %p413_p8 = por %p412_p7, %p411_p6 }
  0x1b   :  { %198 = vadd.xlane.f32.xlu0 %v143_v16  ;;  %v153_v46 = vadd.f32 %v137_v43, %v73_v42  ;;  %v154_v47 = vadd.f32 %v138_v45, %v74_v44  ;;  %v312_v31 = vsub.s32 %v309_v21, %v449_v50  ;;  %v323_v32 = vadd.s32 4294967216, %v447_v49 }
  0x1c   :  { %200 = vadd.xlane.f32.xlu1 %v144_v17  ;;  %v319_v36 = vsub.s32 %v316_v25, %v449_v50  ;;  %v330_v37 = vadd.s32 4294967208, %v447_v49  ;;  %v337_v44 = vadd.s32 4294967200, %v447_v49  ;;  %v344_v51 = vadd.s32 4294967192, %v447_v49  ;;  %p414_p9 = pnand %p413_p8, %p407_p5 }
  0x1d   :  { %v326_v43 = vsub.s32 %v323_v32, %v449_v50  ;;  %vm328_vm9 = vcmask 720512   ;;  %vm335_vm10 = vcmask 786112   ;;  %vm342_vm11 = vcmask 851712  }
  0x1e   :  { %v333_v48 = vsub.s32 %v330_v37, %v449_v50  ;;  %vm349_vm12 = vcmask 917312   ;;  %vm356_vm13 = vcmask 982912   ;;  %vm363_vm14 = vcmask 1048512  }
  0x1f   :  { %202 = vadd.xlane.f32.xlu0 %v145_v22 }
  0x20   :  { %204 = vadd.xlane.f32.xlu1 %v146_v23 }
  0x23   :  { %206 = vadd.xlane.f32.xlu0 %v147_v28 }
  0x24   :  { %208 = vadd.xlane.f32.xlu1 %v148_v29 }
  0x27   :  { %210 = vadd.xlane.f32.xlu0 %v149_v34 }
  0x28   :  { %212 = vadd.xlane.f32.xlu1 %v150_v35 }
  0x2b   :  { %214 = vadd.xlane.f32.xlu0 %v151_v40 }
  0x2c   :  { %216 = vadd.xlane.f32.xlu1 %v152_v41 }
  0x2f   :  { %218 = vadd.xlane.f32.xlu0 %v153_v46 }
  0x30   :  { %220 = vadd.xlane.f32.xlu1 %v154_v47 }
  0x9c   :  { %v191_v52 = vpop.xlane.xlu0 %190 }
  0x9d   :  { %v195_v55 = vpop.xlane.xlu1 %194  ;;  %v222_v57 = vmul.f32 0.00390625, %v191_v52 }
  0x9e   :  { %v224_v61 = vmul.f32 0.00390625, %v195_v55 }
  0x9f   :  { %v259_v4 = vrot.slane %v222_v57, %v258_v56  ;;  %v340_v57 = vsub.s32 %v337_v44, %v449_v50 }
  0xa0   :  { %v193_v62 = vpop.xlane.xlu0 %192  ;;  %v271_v8 = vrot.slane %v224_v61, %v270_v60 }
  0xa1   :  { %v223_v1 = vmul.f32 0.00390625, %v193_v62  ;;  %v197_v2 = vpop.xlane.xlu1 %196  ;;  %v347_v62 = vsub.s32 %v344_v51, %v449_v50 }
  0xa2   :  { %v225_v3 = vmul.f32 0.00390625, %v197_v2 }
  0xa3   :  { %v264_v5 = vrot.slane %v223_v1, %v263_v58  ;;  %v351_v58 = vadd.s32 4294967184, %v447_v49 }
  0xa4   :  { %v278_v9 = vrot.slane %v225_v3, %v277_v63  ;;  %v199_v10 = vpop.xlane.xlu0 %198  ;;  %v358_v63 = vadd.s32 4294967176, %v447_v49 }
  0xa5   :  { %v266_v13 = vsel %vm265_vm0, %v264_v5, %v259_v4  ;;  %v226_v14 = vmul.f32 0.00390625, %v199_v10  ;;  %v201_v15 = vpop.xlane.xlu1 %200  ;;  %v354_v5 = vsub.s32 %v351_v58, %v449_v50 }
  0xa6   :  { %v273_v16 = vsel %vm272_vm1, %v271_v8, %v266_v13  ;;  %v227_v17 = vmul.f32 0.00390625, %v201_v15 }
  0xa7   :  { %v280_v18 = vsel %vm279_vm2, %v278_v9, %v273_v16  ;;  %v285_v19 = vrot.slane %v226_v14, %v284_v6  ;;  %v361_v9 = vsub.s32 %v358_v63, %v449_v50 }
  0xa8   :  { %v292_v22 = vrot.slane %v227_v17, %v291_v11  ;;  %v203_v23 = vpop.xlane.xlu0 %202 }
  0xa9   :  { %v287_v26 = vsel %vm286_vm3, %v285_v19, %v280_v18  ;;  %v228_v27 = vmul.f32 0.00390625, %v203_v23  ;;  %v205_v28 = vpop.xlane.xlu1 %204 }
  0xaa   :  { %v229_v29 = vmul.f32 0.00390625, %v205_v28  ;;  %v294_v33 = vsel %vm293_vm4, %v292_v22, %v287_v26 }
  0xab   :  { %v299_v30 = vrot.slane %v228_v27, %v298_v20 }
  0xac   :  { %v306_v34 = vrot.slane %v229_v29, %v305_v24  ;;  %v207_v35 = vpop.xlane.xlu0 %206 }
  0xad   :  { %v301_v38 = vsel %vm300_vm5, %v299_v30, %v294_v33  ;;  %v230_v39 = vmul.f32 0.00390625, %v207_v35  ;;  %v209_v40 = vpop.xlane.xlu1 %208 }
  0xae   :  { %v231_v41 = vmul.f32 0.00390625, %v209_v40  ;;  %v308_v45 = vsel %vm307_vm6, %v306_v34, %v301_v38 }
  0xaf   :  { %v313_v42 = vrot.slane %v230_v39, %v312_v31 }
  0xb0   :  { %v320_v46 = vrot.slane %v231_v41, %v319_v36  ;;  %v211_v47 = vpop.xlane.xlu0 %210 }
  0xb1   :  { %v315_v52 = vsel %vm314_vm7, %v313_v42, %v308_v45  ;;  %v232_v53 = vmul.f32 0.00390625, %v211_v47  ;;  %v213_v54 = vpop.xlane.xlu1 %212 }
  0xb2   :  { %v233_v55 = vmul.f32 0.00390625, %v213_v54  ;;  %v322_v59 = vsel %vm321_vm8, %v320_v46, %v315_v52 }
  0xb3   :  { %v327_v56 = vrot.slane %v232_v53, %v326_v43 }
  0xb4   :  { %v334_v60 = vrot.slane %v233_v55, %v333_v48  ;;  %v215_v61 = vpop.xlane.xlu0 %214 }
  0xb5   :  { %v329_v0 = vsel %vm328_vm9, %v327_v56, %v322_v59  ;;  %v234_v1 = vmul.f32 0.00390625, %v215_v61  ;;  %v217_v2 = vpop.xlane.xlu1 %216 }
  0xb6   :  { %v235_v3 = vmul.f32 0.00390625, %v217_v2  ;;  %v336_v6 = vsel %vm335_vm10, %v334_v60, %v329_v0 }
  0xb7   :  { %v341_v4 = vrot.slane %v234_v1, %v340_v57 }
  0xb8   :  { %v348_v7 = vrot.slane %v235_v3, %v347_v62  ;;  %v219_v8 = vpop.xlane.xlu0 %218 }
  0xb9   :  { %v343_v10 = vsel %vm342_vm11, %v341_v4, %v336_v6  ;;  %v236_v11 = vmul.f32 0.00390625, %v219_v8  ;;  %v221_v12 = vpop.xlane.xlu1 %220 }
  0xba   :  { %v237_v13 = vmul.f32 0.00390625, %v221_v12  ;;  %v350_v14 = vsel %vm349_vm12, %v348_v7, %v343_v10 }
  0xbb   :  { %v355_v49 = vrot.slane %v236_v11, %v354_v5 }
  0xbc   :  { %v362_v15 = vrot.slane %v237_v13, %v361_v9 }
  0xbd   :  { %v357_v16 = vsel %vm356_vm13, %v355_v49, %v350_v14 }
  0xbe   :  { %v364_v17 = vsel %vm363_vm14, %v362_v15, %v357_v16 }
  0xbf   :  { %366 = vst [vmem:[#allocation6] sm:$0x1] %v364_v17 }
  0xc0   :  { %417 = shalt.err (!%p414_p9)
}
  0xc1   :  { %376 = dma.vmem_to_hbm [thread:$0]  %s374_s14, 16, %s488_s1, [#allocation5]  }
  0xc2   :  { %428 = dma.done.wait [#allocation5], 16  }
  0xc3   :  { %429 = vsyncadd [#allocation5], 4294967280 }
  0xc4   :  { %380 = vsyncpa [#allocation4], 1 }
  0xc5   :  { %381 = vsyncpa [#allocation5], 1 }

</bundles_post_ra>
